<compile_context>
chip_gen: v6e
topology: v6e:2x2x1
jax: 0.10.0
libtpu: 0.0.40
codegen_flags: <defaults>
</compile_context>

<pallas_src>
import jax
import jax.numpy as jnp
from jax.experimental import pallas as pl
from jax.experimental.pallas import tpu as pltpu

D_IN, D_H = 2560, 128
LANE = 128


def _round_up(x, m):
    return (x + m - 1) // m * m


def mlp_kernel(x_ref, w1_ref, b1_ref, w2_ref, b2_ref, w3_ref, b3_ref, o_ref):
    # fc_1: bf16 MXU matmul, f32 accumulate; bias + ReLU in f32 (v5e-safe).
    h1 = jnp.dot(x_ref[...], w1_ref[...], preferred_element_type=jnp.float32)
    h1 = jnp.maximum(h1 + b1_ref[...], 0.0)
    # fc_2 + ReLU
    h2 = jnp.dot(h1.astype(jnp.bfloat16), w2_ref[...],
                 preferred_element_type=jnp.float32)
    h2 = jnp.maximum(h2 + b2_ref[...], 0.0)
    # fc_3 (output padded to 128 lanes -> unmasked, lane-dense store)
    out = jnp.dot(h2.astype(jnp.bfloat16), w3_ref[...],
                  preferred_element_type=jnp.float32)
    o_ref[...] = (out + b3_ref[...]).astype(o_ref.dtype)


def mlp_forward(x, params, *, tb=None):
    """x: (B, C, H, W) float32, flattened like torch .view(B, -1). C*H*W == 2560."""
    w1, b1, w2, b2, w3, b3 = params
    B = x.shape[0]
    num_classes = w3.shape[1]
    n_pad = _round_up(num_classes, LANE)

    # Flatten NCHW row-major (matches torch .view); bf16 activations.
    x2d = x.reshape(B, -1).astype(jnp.bfloat16)
    assert x2d.shape[1] == D_IN

    # Batch tile: multiple of 8 sublanes, capped at 256.
    if tb is None:
        tb = min(256, _round_up(B, 8))
    b_pad = _round_up(B, tb)
    if b_pad != B:
        x2d = jnp.pad(x2d, ((0, b_pad - B), (0, 0)))

    # bf16 weights (MXU input dtype); f32 biases (bias math stays in f32).
    w1b = w1.astype(jnp.bfloat16)
    w2b = w2.astype(jnp.bfloat16)
    w3b = jnp.pad(w3, ((0, 0), (0, n_pad - num_classes))).astype(jnp.bfloat16)
    b1f = b1.astype(jnp.float32)
    b2f = b2.astype(jnp.float32)
    b3f = jnp.pad(b3.astype(jnp.float32), ((0, 0), (0, n_pad - num_classes)))

    const = lambda i: (0, 0)  # same block every step -> weights stay resident
    flops = 2 * b_pad * (D_IN * D_H + D_H * D_H + D_H * n_pad)
    bytes_accessed = (x2d.size * 2 + w1b.size * 2 + w2b.size * 2 + w3b.size * 2
                      + (b1f.size + b2f.size + b3f.size) * 4 + b_pad * n_pad * 4)

    out = pl.pallas_call(
        mlp_kernel,
        out_shape=jax.ShapeDtypeStruct((b_pad, n_pad), jnp.float32),
        grid_spec=pltpu.PrefetchScalarGridSpec(
            num_scalar_prefetch=0,
            grid=(b_pad // tb,),
            in_specs=[
                pl.BlockSpec((tb, D_IN), lambda i: (i, 0)),   # x: batch-tiled
                pl.BlockSpec((D_IN, D_H), const),             # w1
                pl.BlockSpec((1, D_H), const),                # b1
                pl.BlockSpec((D_H, D_H), const),              # w2
                pl.BlockSpec((1, D_H), const),                # b2
                pl.BlockSpec((D_H, n_pad), const),            # w3 (lane-padded)
                pl.BlockSpec((1, n_pad), const),              # b3 (lane-padded)
            ],
            out_specs=pl.BlockSpec((tb, n_pad), lambda i: (i, 0)),
        ),
        compiler_params=pltpu.CompilerParams(
            dimension_semantics=("parallel",),     # 2-TC sharding on v7x
            vmem_limit_bytes=32 * 1024 * 1024,     # safe headroom on all gens
        ),
        cost_estimate=pl.CostEstimate(
            flops=flops, transcendentals=0, bytes_accessed=bytes_accessed),
    )(x2d, w1b, b1f, w2b, b2f, w3b, b3f)

    return out[:B, :num_classes]


def init_params(key, num_classes):
    """Deterministic init; weights stored transposed as (in, out), biases as (1, out)."""
    dims = [(2560, 128), (128, 128), (128, num_classes)]
    params = []
    for d_in, d_out in dims:
        kw, kb, key = jax.random.split(key, 3)
        bound = 1.0 / (d_in ** 0.5)                 # matches torch.nn.Linear default
        w = jax.random.uniform(kw, (d_in, d_out), jnp.float32, -bound, bound)
        b = jax.random.uniform(kb, (1, d_out), jnp.float32, -bound, bound)
        params += [w, b]
    return tuple(params)


def mlp_reference(x, params):
    """Pure-JAX reference mimicking the kernel's bf16-input / f32-accumulate numerics."""
    w1, b1, w2, b2, w3, b3 = params
    h = x.reshape(x.shape[0], -1).astype(jnp.bfloat16)
    h = jnp.maximum(jnp.dot(h, w1.astype(jnp.bfloat16),
                            preferred_element_type=jnp.float32) + b1, 0.0)
    h = jnp.maximum(jnp.dot(h.astype(jnp.bfloat16), w2.astype(jnp.bfloat16),
                            preferred_element_type=jnp.float32) + b2, 0.0)
    return jnp.dot(h.astype(jnp.bfloat16), w3.astype(jnp.bfloat16),
                   preferred_element_type=jnp.float32) + b3


if __name__ == "__main__":
    key = jax.random.PRNGKey(0)
    kx, kp = jax.random.split(key)

    num_classes = 10
    # (B=8, C=10, H=16, W=16) flattens to (8, 2560) = fc_1's in_features.
    x = jax.random.normal(kx, (8, 10, 16, 16), jnp.float32)
    params = init_params(kp, num_classes)

    out = jax.block_until_ready(mlp_forward(x, params))
    ref = mlp_reference(x, params)

    assert out.shape == (8, num_classes)
    assert jnp.allclose(out, ref, atol=1e-2, rtol=1e-2), \
        float(jnp.max(jnp.abs(out - ref)))

    print("KERNEL_OK")
</pallas_src>

<mosaic_0001>
module attributes {stable_mosaic.version = 11 : i64} {
  func.func @mlp_kernel(%arg0: i32, %arg1: memref<8x2560xbf16, #tpu.memory_space<vmem>>, %arg2: memref<2560x128xbf16, #tpu.memory_space<vmem>>, %arg3: memref<1x128xf32, #tpu.memory_space<vmem>>, %arg4: memref<128x128xbf16, #tpu.memory_space<vmem>>, %arg5: memref<1x128xf32, #tpu.memory_space<vmem>>, %arg6: memref<128x128xbf16, #tpu.memory_space<vmem>>, %arg7: memref<1x128xf32, #tpu.memory_space<vmem>>, %arg8: memref<8x128xf32, #tpu.memory_space<vmem>>) attributes {dimension_semantics = [#tpu.dimension_semantics<parallel>], iteration_bounds = array<i64: 1>, scalar_prefetch = 0 : i64, scratch_operands = 0 : i64, tpu.core_type = #tpu.core_type<tc>, window_params = [{transform_indices = @transform_0, window_bounds = array<i64: 8, 2560>}, {pipeline_mode = #tpu.pipeline_mode<synchronous>, transform_indices = @transform_1, window_bounds = array<i64: 2560, 128>}, {pipeline_mode = #tpu.pipeline_mode<synchronous>, transform_indices = @transform_2, window_bounds = array<i64: 1, 128>}, {pipeline_mode = #tpu.pipeline_mode<synchronous>, transform_indices = @transform_3, window_bounds = array<i64: 128, 128>}, {pipeline_mode = #tpu.pipeline_mode<synchronous>, transform_indices = @transform_4, window_bounds = array<i64: 1, 128>}, {pipeline_mode = #tpu.pipeline_mode<synchronous>, transform_indices = @transform_5, window_bounds = array<i64: 128, 128>}, {pipeline_mode = #tpu.pipeline_mode<synchronous>, transform_indices = @transform_6, window_bounds = array<i64: 1, 128>}, {transform_indices = @transform_7, window_bounds = array<i64: 8, 128>}]} {
    %c0 = arith.constant 0 : index
    %c0_0 = arith.constant 0 : index
    %0 = vector.load %arg1[%c0, %c0_0] : memref<8x2560xbf16, #tpu.memory_space<vmem>>, vector<8x2560xbf16>
    %c0_1 = arith.constant 0 : index
    %c0_2 = arith.constant 0 : index
    %1 = vector.load %arg2[%c0_1, %c0_2] : memref<2560x128xbf16, #tpu.memory_space<vmem>>, vector<2560x128xbf16>
    %cst = arith.constant dense<0.000000e+00> : vector<8x128xf32>
    %2 = tpu.matmul %0, %1, %cst {dimension_numbers = #tpu.dot_dimension_numbers<[1], [0], [0], [1], [0, 0, 1, 1], [], []>} : vector<8x2560xbf16>, vector<2560x128xbf16>, vector<8x128xf32> -> vector<8x128xf32>
    %c0_3 = arith.constant 0 : index
    %c0_4 = arith.constant 0 : index
    %3 = vector.load %arg3[%c0_3, %c0_4] : memref<1x128xf32, #tpu.memory_space<vmem>>, vector<1x128xf32>
    %4 = vector.broadcast %3 : vector<1x128xf32> to vector<8x128xf32>
    %5 = arith.addf %2, %4 : vector<8x128xf32>
    %cst_5 = arith.constant 0.000000e+00 : f32
    %6 = vector.broadcast %cst_5 : f32 to vector<8x128xf32>
    %7 = arith.maximumf %5, %6 : vector<8x128xf32>
    %8 = arith.truncf %7 : vector<8x128xf32> to vector<8x128xbf16>
    %c0_6 = arith.constant 0 : index
    %c0_7 = arith.constant 0 : index
    %9 = vector.load %arg4[%c0_6, %c0_7] : memref<128x128xbf16, #tpu.memory_space<vmem>>, vector<128x128xbf16>
    %cst_8 = arith.constant dense<0.000000e+00> : vector<8x128xf32>
    %10 = tpu.matmul %8, %9, %cst_8 {dimension_numbers = #tpu.dot_dimension_numbers<[1], [0], [0], [1], [0, 0, 1, 1], [], []>} : vector<8x128xbf16>, vector<128x128xbf16>, vector<8x128xf32> -> vector<8x128xf32>
    %c0_9 = arith.constant 0 : index
    %c0_10 = arith.constant 0 : index
    %11 = vector.load %arg5[%c0_9, %c0_10] : memref<1x128xf32, #tpu.memory_space<vmem>>, vector<1x128xf32>
    %12 = vector.broadcast %11 : vector<1x128xf32> to vector<8x128xf32>
    %13 = arith.addf %10, %12 : vector<8x128xf32>
    %cst_11 = arith.constant 0.000000e+00 : f32
    %14 = vector.broadcast %cst_11 : f32 to vector<8x128xf32>
    %15 = arith.maximumf %13, %14 : vector<8x128xf32>
    %16 = arith.truncf %15 : vector<8x128xf32> to vector<8x128xbf16>
    %c0_12 = arith.constant 0 : index
    %c0_13 = arith.constant 0 : index
    %17 = vector.load %arg6[%c0_12, %c0_13] : memref<128x128xbf16, #tpu.memory_space<vmem>>, vector<128x128xbf16>
    %cst_14 = arith.constant dense<0.000000e+00> : vector<8x128xf32>
    %18 = tpu.matmul %16, %17, %cst_14 {dimension_numbers = #tpu.dot_dimension_numbers<[1], [0], [0], [1], [0, 0, 1, 1], [], []>} : vector<8x128xbf16>, vector<128x128xbf16>, vector<8x128xf32> -> vector<8x128xf32>
    %c0_15 = arith.constant 0 : index
    %c0_16 = arith.constant 0 : index
    %19 = vector.load %arg7[%c0_15, %c0_16] : memref<1x128xf32, #tpu.memory_space<vmem>>, vector<1x128xf32>
    %20 = vector.broadcast %19 : vector<1x128xf32> to vector<8x128xf32>
    %21 = arith.addf %18, %20 : vector<8x128xf32>
    %c0_17 = arith.constant 0 : index
    %c0_18 = arith.constant 0 : index
    %22 = vector.load %arg8[%c0_17, %c0_18] : memref<8x128xf32, #tpu.memory_space<vmem>>, vector<8x128xf32>
    tpu.vector_store %arg8[%c0_17, %c0_18], %21 {strides = array<i32>} : memref<8x128xf32, #tpu.memory_space<vmem>>, vector<8x128xf32>,
    return
  }
  func.func @transform_0(%arg0: i32) -> (i32, i32) {
    %c0_i32 = arith.constant 0 : i32
    %c0_i32_0 = arith.constant 0 : i32
    return %arg0, %c0_i32 : i32, i32
  }
  func.func @transform_1(%arg0: i32) -> (i32, i32) {
    %c0_i32 = arith.constant 0 : i32
    %c0_i32_0 = arith.constant 0 : i32
    %c0_i32_1 = arith.constant 0 : i32
    return %c0_i32, %c0_i32_0 : i32, i32
  }
  func.func @transform_2(%arg0: i32) -> (i32, i32) {
    %c0_i32 = arith.constant 0 : i32
    %c0_i32_0 = arith.constant 0 : i32
    %c0_i32_1 = arith.constant 0 : i32
    return %c0_i32, %c0_i32_0 : i32, i32
  }
  func.func @transform_3(%arg0: i32) -> (i32, i32) {
    %c0_i32 = arith.constant 0 : i32
    %c0_i32_0 = arith.constant 0 : i32
    %c0_i32_1 = arith.constant 0 : i32
    return %c0_i32, %c0_i32_0 : i32, i32
  }
  func.func @transform_4(%arg0: i32) -> (i32, i32) {
    %c0_i32 = arith.constant 0 : i32
    %c0_i32_0 = arith.constant 0 : i32
    %c0_i32_1 = arith.constant 0 : i32
    return %c0_i32, %c0_i32_0 : i32, i32
  }
  func.func @transform_5(%arg0: i32) -> (i32, i32) {
    %c0_i32 = arith.constant 0 : i32
    %c0_i32_0 = arith.constant 0 : i32
    %c0_i32_1 = arith.constant 0 : i32
    return %c0_i32, %c0_i32_0 : i32, i32
  }
  func.func @transform_6(%arg0: i32) -> (i32, i32) {
    %c0_i32 = arith.constant 0 : i32
    %c0_i32_0 = arith.constant 0 : i32
    %c0_i32_1 = arith.constant 0 : i32
    return %c0_i32, %c0_i32_0 : i32, i32
  }
  func.func @transform_7(%arg0: i32) -> (i32, i32) {
    %c0_i32 = arith.constant 0 : i32
    %c0_i32_0 = arith.constant 0 : i32
    return %arg0, %c0_i32 : i32, i32
  }
}

</mosaic_0001>

<bundles_post_ra>
// kernel: tpu_custom_call.1
= control target key start
LH: loop header
LB: loop body
LE: loop exit
PB: predicated region body
PF: predicated region fallthrough
CT: control target
= control target key end

     0   :  { %12 = vsyncpa [#allocation3], 0  ;;  %s2982_s0 = inlined_call_operand.hbm [shape: bf16[8,2560], index: 0, kind: input, shape index: {}]   ;;  %s2983_s1 = inlined_call_operand.hbm [shape: bf16[2560,128], index: 1, kind: input, shape index: {}]   ;;  %s2984_s2 = inlined_call_operand.vmem [shape: f32[1,128], index: 2, kind: input, shape index: {}]   ;;  %s2985_s3 = inlined_call_operand.hbm [shape: bf16[128,128], index: 3, kind: input, shape index: {}]   ;;  %s2986_s4 = inlined_call_operand.vmem [shape: f32[1,128], index: 4, kind: input, shape index: {}]   ;;  %s2987_s5 = inlined_call_operand.hbm [shape: bf16[128,128], index: 5, kind: input, shape index: {}]   ;;  %s2988_s6 = inlined_call_operand.vmem [shape: f32[1,128], index: 6, kind: input, shape index: {}]   ;;  %s2989_s7 = inlined_call_operand.hbm [shape: f32[8,128], index: 7, kind: output, shape index: {}]  }
   0x1   :  { %13 = vsyncpa [#allocation6], 0 }
   0x2   :  { %14 = vsyncpa [#allocation9], 0 }
   0x3   :  { %15 = vsyncpa [#allocation4], 0  ;;  %s2882_s24 = smov [#allocation5]  }
   0x4   :  { %s31_s25 = sshll.u32 %s2882_s24, 4  ;;  %s32_s25 = int_to_ptr.vmem [resolvable:$true] %s31_s25 }
   0x5   :  { %s2782_s26 = scalar_lea.vmem %s32_s25, 20480  ;;  %p2787_p1 = scmp.lt.s32.totalorder %s32_s25, %s32_s25 }
   0x6   :  { %p2783_p0 = scmp.ne.s32.totalorder %s32_s25, %s2782_s26  ;;  %p2788_p2 = scmp.lt.s32.totalorder %s2782_s26, %s2782_s26 }
   0x8   :  { %p2789_p3 = por %p2788_p2, %p2787_p1 }
   0xa   :  { %p2790_p4 = pnand %p2789_p3, %p2783_p0 }
   0xc   :  { %2793 = shalt.err (!%p2790_p4)
}
   0xd   :  { %s2883_s27 = smov 64   ;;  %s2884_s28 = smov 4  }
   0xe   :  { %37 = dma.hbm_to_vmem [thread:$0]  %s2983_s1, 20480, %s32_s25, [#allocation6], %s2883_s27, %s2883_s27, %s2884_s28  }
   0xf   :  { %s2885_s8 = smov [#allocation2]   ;;  %s2886_s10 = smov [#allocation7]  }
  0x10   :  { %s22_s9 = sshll.u32 %s2885_s8, 4  ;;  %s45_s11 = sshll.u32 %s2886_s10, 4  ;;  %s23_s9 = int_to_ptr.vmem [resolvable:$true] %s22_s9  ;;  %s46_s11 = int_to_ptr.vmem [resolvable:$true] %s45_s11 }
  0x11   :  { %s2802_s12 = scalar_lea.vmem %s23_s9, 1280  ;;  %p2807_p6 = scmp.lt.s32.totalorder %s23_s9, %s23_s9 }
  0x12   :  { %p2803_p5 = scmp.ne.s32.totalorder %s23_s9, %s2802_s12  ;;  %p2808_p7 = scmp.lt.s32.totalorder %s2802_s12, %s2802_s12 }
  0x14   :  { %p2809_p8 = por %p2808_p7, %p2807_p6 }
  0x16   :  { %p2810_p9 = pnand %p2809_p8, %p2803_p5 }
  0x18   :  { %2813 = shalt.err (!%p2810_p9)
}
  0x19   :  { %25 = dma.hbm_to_vmem [thread:$0]  %s2982_s0, 1280, %s23_s9, [#allocation3]  }
  0x1a   :  { %s2822_s15 = scalar_lea.vmem %s46_s11, 1024  ;;  %p2827_p11 = scmp.lt.s32.totalorder %s46_s11, %s46_s11 }
  0x1b   :  { %p2823_p10 = scmp.ne.s32.totalorder %s46_s11, %s2822_s15  ;;  %p2828_p12 = scmp.lt.s32.totalorder %s2822_s15, %s2822_s15 }
  0x1d   :  { %p2829_p13 = por %p2828_p12, %p2827_p11 }
  0x1f   :  { %p2830_p0 = pnand %p2829_p13, %p2823_p10 }
  0x21   :  { %2833 = shalt.err (!%p2830_p0)
}
  0x22   :  { %51 = dma.hbm_to_vmem [thread:$0]  %s2985_s3, 1024, %s46_s11, [#allocation6], %s2883_s27, %s2883_s27, %s2884_s28  }
  0x23   :  { %s2887_s17 = smov [#allocation8]  }
  0x24   :  { %s59_s18 = sshll.u32 %s2887_s17, 4  ;;  %s60_s18 = int_to_ptr.vmem [resolvable:$true] %s59_s18 }
  0x25   :  { %s2842_s19 = scalar_lea.vmem %s60_s18, 1024  ;;  %p2847_p2 = scmp.lt.s32.totalorder %s60_s18, %s60_s18 }
  0x26   :  { %p2843_p1 = scmp.ne.s32.totalorder %s60_s18, %s2842_s19  ;;  %p2848_p3 = scmp.lt.s32.totalorder %s2842_s19, %s2842_s19 }
  0x28   :  { %p2849_p4 = por %p2848_p3, %p2847_p2 }
  0x2a   :  { %p2850_p5 = pnand %p2849_p4, %p2843_p1 }
  0x2c   :  { %2853 = shalt.err (!%p2850_p5)
}
  0x2d   :  { %65 = dma.hbm_to_vmem [thread:$0]  %s2987_s5, 1024, %s60_s18, [#allocation9], %s2883_s27, %s2883_s27, %s2884_s28  }
  0x2e   :  { %2874 = dma.done.wait [#allocation3], 1280  }
  0x2f   :  { %2875 = vsyncadd [#allocation3], 4294966016 }
  0x30   :  { %2876 = dma.done.wait [#allocation6], 21504  }
  0x31   :  { %2877 = vsyncadd [#allocation6], 4294945792 }
  0x32   :  { %2878 = dma.done.wait [#allocation9], 1024  }
  0x33   :  { %2879 = vsyncadd [#allocation9], 4294966272  ;;  %v2578_v0 = vld [vmem:[#allocation5 + $0x78] sm:$0xff]   ;;  %v2582_v4 = vld [vmem:[#allocation5 + $0x70] sm:$0xff]   ;;  %vm2889_vm0 = vmmov 0   ;;  %s2890_s24 = smov [#allocation10]  }
  0x34   :  { %v2579_v1 = vld [vmem:[#allocation5 + $0xf8] sm:$0xff]   ;;  %2291 = vmatprep.subr.bf16.mxu0 %v2578_v0  ;;  %v2583_v5 = vld [vmem:[#allocation5 + $0xf0] sm:$0xff]   ;;  %v2586_v8 = vld [vmem:[#allocation5 + $0x68] sm:$0xff]   ;;  %s2081_s25 = sshll.u32 %s2890_s24, 4  ;;  %s2082_s25 = int_to_ptr.vmem [resolvable:$true] %s2081_s25 }
  0x35   :  { %v2580_v2 = vld [vmem:[#allocation5 + $0x38] sm:$0xff]   ;;  %2313 = vmatprep.subr.bf16.mxu1 %v2579_v1  ;;  %v2584_v6 = vld [vmem:[#allocation5 + $0x30] sm:$0xff]   ;;  %v2587_v9 = vld [vmem:[#allocation5 + $0xe8] sm:$0xff]   ;;  %p2859_p7 = scmp.lt.s32.totalorder %s2082_s25, %s2082_s25 }
  0x36   :  { %v2581_v3 = vld [vmem:[#allocation5 + $0xb8] sm:$0xff]   ;;  %2292 = vmatpush3.bf16.msra.mxu0 %v2580_v2  ;;  %v2585_v7 = vld [vmem:[#allocation5 + $0xb0] sm:$0xff]   ;;  %v2588_v10 = vld [vmem:[#allocation5 + $0x28] sm:$0xff]  }
  0x37   :  { %2314 = vmatpush3.bf16.msra.mxu1 %v2581_v3  ;;  %2293 = vmatprep.subr.bf16.mxu0 %v2582_v4  ;;  %v2589_v11 = vld [vmem:[#allocation5 + $0xa8] sm:$0xff]   ;;  %v2590_v12 = vld [vmem:[#allocation5 + $0x60] sm:$0xff]   ;;  %v2594_v16 = vld [vmem:[#allocation5 + $0x58] sm:$0xff]  }
  0x38   :  { %2315 = vmatprep.subr.bf16.mxu1 %v2583_v5  ;;  %v2591_v13 = vld [vmem:[#allocation5 + $0xe0] sm:$0xff]   ;;  %v2595_v17 = vld [vmem:[#allocation5 + $0xd8] sm:$0xff]   ;;  %v2598_v20 = vld [vmem:[#allocation5 + $0x50] sm:$0xff]  }
  0x39   :  { %v2592_v14 = vld [vmem:[#allocation5 + $0x20] sm:$0xff]   ;;  %v2596_v18 = vld [vmem:[#allocation5 + $0x18] sm:$0xff]   ;;  %v2599_v21 = vld [vmem:[#allocation5 + $0xd0] sm:$0xff]  }
  0x3a   :  { %2294 = vmatpush3.bf16.msra.mxu0 %v2584_v6  ;;  %v2593_v15 = vld [vmem:[#allocation5 + $0xa0] sm:$0xff]   ;;  %v2597_v19 = vld [vmem:[#allocation5 + $0x98] sm:$0xff]   ;;  %v2600_v22 = vld [vmem:[#allocation5 + $0x10] sm:$0xff]  }
  0x3b   :  { %2316 = vmatpush3.bf16.msra.mxu1 %v2585_v7  ;;  %2295 = vmatprep.subr.bf16.mxu0 %v2586_v8  ;;  %v2601_v23 = vld [vmem:[#allocation5 + $0x90] sm:$0xff]   ;;  %v2602_v24 = vld [vmem:[#allocation5 + $0x48] sm:$0xff]   ;;  %v2606_v28 = vld [vmem:[#allocation5 + $0x40] sm:$0xff]  }
  0x3c   :  { %2317 = vmatprep.subr.bf16.mxu1 %v2587_v9  ;;  %v2603_v25 = vld [vmem:[#allocation5 + $0xc8] sm:$0xff]   ;;  %v2607_v29 = vld [vmem:[#allocation5 + $0xc0] sm:$0xff]   ;;  %v81_v32 = vld [vmem:[#allocation2] sm:$0xff] }
  0x3d   :  { %v2604_v26 = vld [vmem:[#allocation5 + $0x8] sm:$0xff]   ;;  %v2608_v30 = vld [vmem:[#allocation5] sm:$0xff]   ;;  %v82_v33 = vld [vmem:[#allocation2 + $0x8] sm:$0xff]  ;;  %v2093_v34 = vcombine.low %v81_v32, %v81_v32  ;;  %v2094_v35 = vcombine.high %v81_v32, %v81_v32 }
  0x3e   :  { %2296 = vmatpush3.bf16.msra.mxu0 %v2588_v10  ;;  %v2605_v27 = vld [vmem:[#allocation5 + $0x88] sm:$0xff]   ;;  %v2609_v31 = vld [vmem:[#allocation5 + $0x80] sm:$0xff]   ;;  %v2095_v36 = vcombine.low %v82_v33, %v82_v33  ;;  %v2096_v37 = vcombine.high %v82_v33, %v82_v33  ;;  %v2614_v38 = vld [vmem:[#allocation5 + $0x178] sm:$0xff]  }
  0x3f   :  { %2318 = vmatpush3.bf16.msra.mxu1 %v2589_v11  ;;  %2297 = vmatprep.subr.bf16.mxu0 %v2590_v12  ;;  %v2615_v39 = vld [vmem:[#allocation5 + $0x1f8] sm:$0xff]   ;;  %v2618_v42 = vld [vmem:[#allocation5 + $0x170] sm:$0xff]   ;;  %v2622_v46 = vld [vmem:[#allocation5 + $0x168] sm:$0xff]  }
  0x40   :  { %2319 = vmatprep.subr.bf16.mxu1 %v2591_v13  ;;  %1480 = vmatprep.mubr.bf16.mxu0 %v2094_v35  ;;  %v2616_v40 = vld [vmem:[#allocation5 + $0x138] sm:$0xff]   ;;  %v2619_v43 = vld [vmem:[#allocation5 + $0x1f0] sm:$0xff]   ;;  %v2623_v47 = vld [vmem:[#allocation5 + $0x1e8] sm:$0xff]  }
  0x41   :  { %1520 = vmatprep.mubr.bf16.mxu1 %v2096_v37  ;;  %v2617_v41 = vld [vmem:[#allocation5 + $0x1b8] sm:$0xff]   ;;  %v2620_v44 = vld [vmem:[#allocation5 + $0x130] sm:$0xff]   ;;  %v2624_v48 = vld [vmem:[#allocation5 + $0x128] sm:$0xff]  }
  0x42   :  { %2298 = vmatpush3.bf16.msra.mxu0 %v2592_v14  ;;  %v2621_v45 = vld [vmem:[#allocation5 + $0x1b0] sm:$0xff]   ;;  %v2625_v49 = vld [vmem:[#allocation5 + $0x1a8] sm:$0xff]   ;;  %v2626_v50 = vld [vmem:[#allocation5 + $0x160] sm:$0xff]  }
  0x43   :  { %2320 = vmatpush3.bf16.msra.mxu1 %v2593_v15  ;;  %2299 = vmatprep.subr.bf16.mxu0 %v2594_v16  ;;  %v2627_v51 = vld [vmem:[#allocation5 + $0x1e0] sm:$0xff]   ;;  %v2630_v54 = vld [vmem:[#allocation5 + $0x158] sm:$0xff]   ;;  %v2634_v58 = vld [vmem:[#allocation5 + $0x150] sm:$0xff]  }
  0x44   :  { %2321 = vmatprep.subr.bf16.mxu1 %v2595_v17  ;;  %v2628_v52 = vld [vmem:[#allocation5 + $0x120] sm:$0xff]   ;;  %v2631_v55 = vld [vmem:[#allocation5 + $0x1d8] sm:$0xff]   ;;  %v2635_v59 = vld [vmem:[#allocation5 + $0x1d0] sm:$0xff]  }
  0x45   :  { %v2629_v53 = vld [vmem:[#allocation5 + $0x1a0] sm:$0xff]   ;;  %v2632_v56 = vld [vmem:[#allocation5 + $0x118] sm:$0xff]   ;;  %v2636_v60 = vld [vmem:[#allocation5 + $0x110] sm:$0xff]  }
  0x46   :  { %2300 = vmatpush3.bf16.msra.mxu0 %v2596_v18  ;;  %v2633_v57 = vld [vmem:[#allocation5 + $0x198] sm:$0xff]   ;;  %v2637_v61 = vld [vmem:[#allocation5 + $0x190] sm:$0xff]   ;;  %v2638_v62 = vld [vmem:[#allocation5 + $0x148] sm:$0xff]  }
  0x47   :  { %2322 = vmatpush3.bf16.msra.mxu1 %v2597_v19  ;;  %2301 = vmatprep.subr.bf16.mxu0 %v2598_v20  ;;  %v2639_v63 = vld [vmem:[#allocation5 + $0x1c8] sm:$0xff]   ;;  %v2642_v2 = vld [vmem:[#allocation5 + $0x140] sm:$0xff]   ;;  %v2650_v12 = vld [vmem:[#allocation5 + $0x278] sm:$0xff]  }
  0x48   :  { %2323 = vmatprep.subr.bf16.mxu1 %v2599_v21  ;;  %v2640_v0 = vld [vmem:[#allocation5 + $0x108] sm:$0xff]   ;;  %v2643_v3 = vld [vmem:[#allocation5 + $0x1c0] sm:$0xff]   ;;  %v2651_v13 = vld [vmem:[#allocation5 + $0x2f8] sm:$0xff]  }
  0x49   :  { %v2641_v1 = vld [vmem:[#allocation5 + $0x188] sm:$0xff]   ;;  %v2644_v4 = vld [vmem:[#allocation5 + $0x100] sm:$0xff]   ;;  %v2652_v14 = vld [vmem:[#allocation5 + $0x238] sm:$0xff]  }
  0x4a   :  { %2302 = vmatpush3.bf16.msra.mxu0 %v2600_v22  ;;  %v2645_v5 = vld [vmem:[#allocation5 + $0x180] sm:$0xff]   ;;  %v84_v9 = vld [vmem:[#allocation2 + $0x18] sm:$0xff]  ;;  %v2653_v15 = vld [vmem:[#allocation5 + $0x2b8] sm:$0xff]  }
  0x4b   :  { %2324 = vmatpush3.bf16.msra.mxu1 %v2601_v23  ;;  %2303 = vmatprep.subr.bf16.mxu0 %v2602_v24  ;;  %v83_v6 = vld [vmem:[#allocation2 + $0x10] sm:$0xff]  ;;  %v2099_v10 = vcombine.low %v84_v9, %v84_v9  ;;  %v2100_v11 = vcombine.high %v84_v9, %v84_v9  ;;  %v2654_v16 = vld [vmem:[#allocation5 + $0x270] sm:$0xff]   ;;  %v2658_v20 = vld [vmem:[#allocation5 + $0x268] sm:$0xff]  }
  0x4c   :  { %2325 = vmatprep.subr.bf16.mxu1 %v2603_v25  ;;  %v2097_v7 = vcombine.low %v83_v6, %v83_v6  ;;  %v2098_v8 = vcombine.high %v83_v6, %v83_v6  ;;  %v2655_v17 = vld [vmem:[#allocation5 + $0x2f0] sm:$0xff]   ;;  %v2659_v21 = vld [vmem:[#allocation5 + $0x2e8] sm:$0xff]   ;;  %v2662_v24 = vld [vmem:[#allocation5 + $0x260] sm:$0xff]  }
  0x4d   :  { %v2656_v18 = vld [vmem:[#allocation5 + $0x230] sm:$0xff]   ;;  %v2660_v22 = vld [vmem:[#allocation5 + $0x228] sm:$0xff]   ;;  %v2663_v25 = vld [vmem:[#allocation5 + $0x2e0] sm:$0xff]  }
  0x4e   :  { %2304 = vmatpush3.bf16.msra.mxu0 %v2604_v26  ;;  %v2657_v19 = vld [vmem:[#allocation5 + $0x2b0] sm:$0xff]   ;;  %v2661_v23 = vld [vmem:[#allocation5 + $0x2a8] sm:$0xff]   ;;  %v2664_v26 = vld [vmem:[#allocation5 + $0x220] sm:$0xff]  }
  0x4f   :  { %2326 = vmatpush3.bf16.msra.mxu1 %v2605_v27  ;;  %2305 = vmatprep.subr.bf16.mxu0 %v2606_v28  ;;  %v2665_v27 = vld [vmem:[#allocation5 + $0x2a0] sm:$0xff]   ;;  %v2666_v28 = vld [vmem:[#allocation5 + $0x258] sm:$0xff]   ;;  %v2670_v32 = vld [vmem:[#allocation5 + $0x250] sm:$0xff]  }
  0x50   :  { %2327 = vmatprep.subr.bf16.mxu1 %v2607_v29  ;;  %v2667_v29 = vld [vmem:[#allocation5 + $0x2d8] sm:$0xff]   ;;  %v2671_v33 = vld [vmem:[#allocation5 + $0x2d0] sm:$0xff]   ;;  %v2675_v37 = vld [vmem:[#allocation5 + $0x2c8] sm:$0xff]  }
  0x51   :  { %v2673_v35 = vld [vmem:[#allocation5 + $0x290] sm:$0xff]  }
  0x52   :  { %2306 = vmatpush3.bf16.msra.mxu0 %v2608_v30  ;;  %v2668_v30 = vld [vmem:[#allocation5 + $0x218] sm:$0xff]   ;;  %v2706_v6 = vld [vmem:[#allocation5 + $0x350] sm:$0xff]  }
  0x53   :  { %2328 = vmatpush3.bf16.msra.mxu1 %v2609_v31  ;;  %2335 = vmatprep.subr.bf16.mxu0 %v2614_v38  ;;  %v2669_v31 = vld [vmem:[#allocation5 + $0x298] sm:$0xff]   ;;  %v2676_v38 = vld [vmem:[#allocation5 + $0x208] sm:$0xff]   ;;  %v2709_v9 = vld [vmem:[#allocation5 + $0x390] sm:$0xff]  }
  0x54   :  { %2357 = vmatprep.subr.bf16.mxu1 %v2615_v39  ;;  %v2677_v39 = vld [vmem:[#allocation5 + $0x288] sm:$0xff]  }
  0x55   :  { %1481 = vmatmul.mubr.bf16.vlgmr.msra.gmra.mxu0 %v2093_v34  ;;  %v2672_v34 = vld [vmem:[#allocation5 + $0x210] sm:$0xff]  }
  0x56   :  { %1521 = vmatmul.mubr.bf16.vlgmr.msra.gmra.mxu1 %v2095_v36  ;;  %2336 = vmatpush3.bf16.msra.mxu0 %v2616_v40  ;;  %v2674_v36 = vld [vmem:[#allocation5 + $0x248] sm:$0xff]   ;;  %v2678_v40 = vld [vmem:[#allocation5 + $0x240] sm:$0xff]  }
  0x57   :  { %2358 = vmatpush3.bf16.msra.mxu1 %v2617_v41  ;;  %2337 = vmatprep.subr.bf16.mxu0 %v2618_v42  ;;  %v2679_v41 = vld [vmem:[#allocation5 + $0x2c0] sm:$0xff]  }
  0x58   :  { %2359 = vmatprep.subr.bf16.mxu1 %v2619_v43  ;;  %1560 = vmatprep.mubr.bf16.mxu0 %v2098_v8  ;;  %v2680_v42 = vld [vmem:[#allocation5 + $0x200] sm:$0xff]   ;;  %v2708_v8 = vld [vmem:[#allocation5 + $0x310] sm:$0xff]  }
  0x59   :  { %1600 = vmatprep.mubr.bf16.mxu1 %v2100_v11  ;;  %v2681_v43 = vld [vmem:[#allocation5 + $0x280] sm:$0xff]   ;;  %v2711_v11 = vld [vmem:[#allocation5 + $0x3c8] sm:$0xff]  }
  0x5a   :  { %2338 = vmatpush3.bf16.msra.mxu0 %v2620_v44  ;;  %v85_v44 = vld [vmem:[#allocation2 + $0x20] sm:$0xff] }
  0x5b   :  { %2360 = vmatpush3.bf16.msra.mxu1 %v2621_v45  ;;  %2339 = vmatprep.subr.bf16.mxu0 %v2622_v46  ;;  %v86_v45 = vld [vmem:[#allocation2 + $0x28] sm:$0xff]  ;;  %v2101_v46 = vcombine.low %v85_v44, %v85_v44 }
  0x5c   :  { %2361 = vmatprep.subr.bf16.mxu1 %v2623_v47  ;;  %v2102_v47 = vcombine.high %v85_v44, %v85_v44  ;;  %v2742_v44 = vld [vmem:[#allocation5 + $0x450] sm:$0xff]  }
  0x5e   :  { %2340 = vmatpush3.bf16.msra.mxu0 %v2624_v48  ;;  %v2103_v48 = vcombine.low %v86_v45, %v86_v45 }
  0x5f   :  { %2362 = vmatpush3.bf16.msra.mxu1 %v2625_v49  ;;  %2341 = vmatprep.subr.bf16.mxu0 %v2626_v50  ;;  %v2104_v49 = vcombine.high %v86_v45, %v86_v45  ;;  %v2686_v50 = vld [vmem:[#allocation5 + $0x378] sm:$0xff]   ;;  %v2743_v45 = vld [vmem:[#allocation5 + $0x4d0] sm:$0xff]  }
  0x60   :  { %2363 = vmatprep.subr.bf16.mxu1 %v2627_v51  ;;  %v2687_v51 = vld [vmem:[#allocation5 + $0x3f8] sm:$0xff]  }
  0x62   :  { %2342 = vmatpush3.bf16.msra.mxu0 %v2628_v52  ;;  %v2688_v52 = vld [vmem:[#allocation5 + $0x338] sm:$0xff]  }
  0x63   :  { %2364 = vmatpush3.bf16.msra.mxu1 %v2629_v53  ;;  %2343 = vmatprep.subr.bf16.mxu0 %v2630_v54  ;;  %v2689_v53 = vld [vmem:[#allocation5 + $0x3b8] sm:$0xff]   ;;  %v2690_v54 = vld [vmem:[#allocation5 + $0x370] sm:$0xff]  }
  0x64   :  { %2365 = vmatprep.subr.bf16.mxu1 %v2631_v55  ;;  %v2691_v55 = vld [vmem:[#allocation5 + $0x3f0] sm:$0xff]  }
  0x66   :  { %2344 = vmatpush3.bf16.msra.mxu0 %v2632_v56  ;;  %v2692_v56 = vld [vmem:[#allocation5 + $0x330] sm:$0xff]  }
  0x67   :  { %2366 = vmatpush3.bf16.msra.mxu1 %v2633_v57  ;;  %2345 = vmatprep.subr.bf16.mxu0 %v2634_v58  ;;  %v2693_v57 = vld [vmem:[#allocation5 + $0x3b0] sm:$0xff]   ;;  %v2694_v58 = vld [vmem:[#allocation5 + $0x368] sm:$0xff]  }
  0x68   :  { %2367 = vmatprep.subr.bf16.mxu1 %v2635_v59  ;;  %v2695_v59 = vld [vmem:[#allocation5 + $0x3e8] sm:$0xff]  }
  0x6a   :  { %2346 = vmatpush3.bf16.msra.mxu0 %v2636_v60  ;;  %v2696_v60 = vld [vmem:[#allocation5 + $0x328] sm:$0xff]  }
  0x6b   :  { %2368 = vmatpush3.bf16.msra.mxu1 %v2637_v61  ;;  %2347 = vmatprep.subr.bf16.mxu0 %v2638_v62  ;;  %v2697_v61 = vld [vmem:[#allocation5 + $0x3a8] sm:$0xff]   ;;  %v2698_v62 = vld [vmem:[#allocation5 + $0x360] sm:$0xff]  }
  0x6c   :  { %2369 = vmatprep.subr.bf16.mxu1 %v2639_v63  ;;  %v2699_v63 = vld [vmem:[#allocation5 + $0x3e0] sm:$0xff]  }
  0x6e   :  { %2348 = vmatpush3.bf16.msra.mxu0 %v2640_v0  ;;  %v2700_v0 = vld [vmem:[#allocation5 + $0x320] sm:$0xff]  }
  0x6f   :  { %2370 = vmatpush3.bf16.msra.mxu1 %v2641_v1  ;;  %2349 = vmatprep.subr.bf16.mxu0 %v2642_v2  ;;  %v2701_v1 = vld [vmem:[#allocation5 + $0x3a0] sm:$0xff]   ;;  %v2702_v2 = vld [vmem:[#allocation5 + $0x358] sm:$0xff]  }
  0x70   :  { %2371 = vmatprep.subr.bf16.mxu1 %v2643_v3  ;;  %v2703_v3 = vld [vmem:[#allocation5 + $0x3d8] sm:$0xff]  }
  0x72   :  { %2350 = vmatpush3.bf16.msra.mxu0 %v2644_v4  ;;  %v2704_v4 = vld [vmem:[#allocation5 + $0x318] sm:$0xff]  }
  0x73   :  { %2372 = vmatpush3.bf16.msra.mxu1 %v2645_v5  ;;  %2379 = vmatprep.subr.bf16.mxu0 %v2650_v12  ;;  %v2705_v5 = vld [vmem:[#allocation5 + $0x398] sm:$0xff]   ;;  %v2712_v12 = vld [vmem:[#allocation5 + $0x308] sm:$0xff]  }
  0x74   :  { %2401 = vmatprep.subr.bf16.mxu1 %v2651_v13  ;;  %v2713_v13 = vld [vmem:[#allocation5 + $0x388] sm:$0xff]  }
  0x75   :  { %1561 = vmatmul.mubr.bf16.vlgmr.msra.gmra.mxu0 %v2097_v7  ;;  %v2707_v7 = vld [vmem:[#allocation5 + $0x3d0] sm:$0xff]  }
  0x76   :  { %1601 = vmatmul.mubr.bf16.vlgmr.msra.gmra.mxu1 %v2099_v10  ;;  %2380 = vmatpush3.bf16.msra.mxu0 %v2652_v14  ;;  %v2710_v10 = vld [vmem:[#allocation5 + $0x348] sm:$0xff]   ;;  %v2714_v14 = vld [vmem:[#allocation5 + $0x340] sm:$0xff]  }
  0x77   :  { %2402 = vmatpush3.bf16.msra.mxu1 %v2653_v15  ;;  %2381 = vmatprep.subr.bf16.mxu0 %v2654_v16  ;;  %v2715_v15 = vld [vmem:[#allocation5 + $0x3c0] sm:$0xff]  }
  0x78   :  { %2403 = vmatprep.subr.bf16.mxu1 %v2655_v17  ;;  %1640 = vmatprep.mubr.bf16.mxu0 %v2102_v47  ;;  %v2716_v16 = vld [vmem:[#allocation5 + $0x300] sm:$0xff]   ;;  %v2745_v47 = vld [vmem:[#allocation5 + $0x490] sm:$0xff]  }
  0x79   :  { %1680 = vmatprep.mubr.bf16.mxu1 %v2104_v49  ;;  %v2717_v17 = vld [vmem:[#allocation5 + $0x380] sm:$0xff]   ;;  %v2747_v49 = vld [vmem:[#allocation5 + $0x4c8] sm:$0xff]  }
  0x7a   :  { %2382 = vmatpush3.bf16.msra.mxu0 %v2656_v18  ;;  %v87_v18 = vld [vmem:[#allocation2 + $0x30] sm:$0xff] }
  0x7b   :  { %2404 = vmatpush3.bf16.msra.mxu1 %v2657_v19  ;;  %2383 = vmatprep.subr.bf16.mxu0 %v2658_v20  ;;  %v88_v19 = vld [vmem:[#allocation2 + $0x38] sm:$0xff]  ;;  %v2105_v20 = vcombine.low %v87_v18, %v87_v18 }
  0x7c   :  { %2405 = vmatprep.subr.bf16.mxu1 %v2659_v21  ;;  %v2106_v21 = vcombine.high %v87_v18, %v87_v18  ;;  %v2764_v18 = vld [vmem:[#allocation7 + $0x8] sm:$0xff]  }
  0x7e   :  { %2384 = vmatpush3.bf16.msra.mxu0 %v2660_v22  ;;  %v2107_v22 = vcombine.low %v88_v19, %v88_v19 }
  0x7f   :  { %2406 = vmatpush3.bf16.msra.mxu1 %v2661_v23  ;;  %2385 = vmatprep.subr.bf16.mxu0 %v2662_v24  ;;  %v2722_v23 = vld [vmem:[#allocation5 + $0x478] sm:$0xff]   ;;  %v2108_v24 = vcombine.high %v88_v19, %v88_v19  ;;  %v2765_v19 = vld [vmem:[#allocation7] sm:$0xff]  }
  0x80   :  { %2407 = vmatprep.subr.bf16.mxu1 %v2663_v25  ;;  %v2723_v25 = vld [vmem:[#allocation5 + $0x4f8] sm:$0xff]  }
  0x82   :  { %2386 = vmatpush3.bf16.msra.mxu0 %v2664_v26  ;;  %v2724_v26 = vld [vmem:[#allocation5 + $0x438] sm:$0xff]  }
  0x83   :  { %2408 = vmatpush3.bf16.msra.mxu1 %v2665_v27  ;;  %2387 = vmatprep.subr.bf16.mxu0 %v2666_v28  ;;  %v2725_v27 = vld [vmem:[#allocation5 + $0x4b8] sm:$0xff]   ;;  %v2726_v28 = vld [vmem:[#allocation5 + $0x470] sm:$0xff]  }
  0x84   :  { %2409 = vmatprep.subr.bf16.mxu1 %v2667_v29  ;;  %v2727_v29 = vld [vmem:[#allocation5 + $0x4f0] sm:$0xff]  }
  0x86   :  { %2388 = vmatpush3.bf16.msra.mxu0 %v2668_v30  ;;  %v2728_v30 = vld [vmem:[#allocation5 + $0x430] sm:$0xff]  }
  0x87   :  { %2410 = vmatpush3.bf16.msra.mxu1 %v2669_v31  ;;  %2389 = vmatprep.subr.bf16.mxu0 %v2670_v32  ;;  %v2729_v31 = vld [vmem:[#allocation5 + $0x4b0] sm:$0xff]   ;;  %v2730_v32 = vld [vmem:[#allocation5 + $0x468] sm:$0xff]  }
  0x88   :  { %2411 = vmatprep.subr.bf16.mxu1 %v2671_v33  ;;  %v2731_v33 = vld [vmem:[#allocation5 + $0x4e8] sm:$0xff]  }
  0x8a   :  { %2390 = vmatpush3.bf16.msra.mxu0 %v2672_v34  ;;  %v2732_v34 = vld [vmem:[#allocation5 + $0x428] sm:$0xff]  }
  0x8b   :  { %2412 = vmatpush3.bf16.msra.mxu1 %v2673_v35  ;;  %2391 = vmatprep.subr.bf16.mxu0 %v2674_v36  ;;  %v2733_v35 = vld [vmem:[#allocation5 + $0x4a8] sm:$0xff]   ;;  %v2734_v36 = vld [vmem:[#allocation5 + $0x460] sm:$0xff]  }
  0x8c   :  { %2413 = vmatprep.subr.bf16.mxu1 %v2675_v37  ;;  %v2735_v37 = vld [vmem:[#allocation5 + $0x4e0] sm:$0xff]  }
  0x8e   :  { %2392 = vmatpush3.bf16.msra.mxu0 %v2676_v38  ;;  %v2736_v38 = vld [vmem:[#allocation5 + $0x420] sm:$0xff]  }
  0x8f   :  { %2414 = vmatpush3.bf16.msra.mxu1 %v2677_v39  ;;  %2393 = vmatprep.subr.bf16.mxu0 %v2678_v40  ;;  %v2737_v39 = vld [vmem:[#allocation5 + $0x4a0] sm:$0xff]   ;;  %v2738_v40 = vld [vmem:[#allocation5 + $0x458] sm:$0xff]  }
  0x90   :  { %2415 = vmatprep.subr.bf16.mxu1 %v2679_v41  ;;  %v2739_v41 = vld [vmem:[#allocation5 + $0x4d8] sm:$0xff]  }
  0x92   :  { %2394 = vmatpush3.bf16.msra.mxu0 %v2680_v42  ;;  %v2740_v42 = vld [vmem:[#allocation5 + $0x418] sm:$0xff]  }
  0x93   :  { %2416 = vmatpush3.bf16.msra.mxu1 %v2681_v43  ;;  %2423 = vmatprep.subr.bf16.mxu0 %v2686_v50  ;;  %v2741_v43 = vld [vmem:[#allocation5 + $0x498] sm:$0xff]   ;;  %v2748_v50 = vld [vmem:[#allocation5 + $0x408] sm:$0xff]  }
  0x94   :  { %2445 = vmatprep.subr.bf16.mxu1 %v2687_v51  ;;  %v2749_v51 = vld [vmem:[#allocation5 + $0x488] sm:$0xff]  }
  0x95   :  { %1641 = vmatmul.mubr.bf16.vlgmr.msra.gmra.mxu0 %v2101_v46  ;;  %v2744_v46 = vld [vmem:[#allocation5 + $0x410] sm:$0xff]  }
  0x96   :  { %1681 = vmatmul.mubr.bf16.vlgmr.msra.gmra.mxu1 %v2103_v48  ;;  %2424 = vmatpush3.bf16.msra.mxu0 %v2688_v52  ;;  %v2746_v48 = vld [vmem:[#allocation5 + $0x448] sm:$0xff]   ;;  %v2750_v52 = vld [vmem:[#allocation5 + $0x440] sm:$0xff]  }
  0x97   :  { %2446 = vmatpush3.bf16.msra.mxu1 %v2689_v53  ;;  %2425 = vmatprep.subr.bf16.mxu0 %v2690_v54  ;;  %v2751_v53 = vld [vmem:[#allocation5 + $0x4c0] sm:$0xff]  }
  0x98   :  { %2447 = vmatprep.subr.bf16.mxu1 %v2691_v55  ;;  %1720 = vmatprep.mubr.bf16.mxu0 %v2106_v21  ;;  %v2752_v54 = vld [vmem:[#allocation5 + $0x400] sm:$0xff]   ;;  %v2767_v21 = vld [vmem:[#allocation8 + $0x30] sm:$0xff]  }
  0x99   :  { %1760 = vmatprep.mubr.bf16.mxu1 %v2108_v24  ;;  %v2753_v55 = vld [vmem:[#allocation5 + $0x480] sm:$0xff]   ;;  %v2770_v24 = vld [vmem:[#allocation8 + $0x18] sm:$0xff]  }
  0x9a   :  { %2426 = vmatpush3.bf16.msra.mxu0 %v2692_v56  ;;  %v89_v56 = vld [vmem:[#allocation2 + $0x40] sm:$0xff] }
  0x9b   :  { %2448 = vmatpush3.bf16.msra.mxu1 %v2693_v57  ;;  %2427 = vmatprep.subr.bf16.mxu0 %v2694_v58  ;;  %v2109_v57 = vcombine.low %v89_v56, %v89_v56  ;;  %v2110_v58 = vcombine.high %v89_v56, %v89_v56 }
  0x9c   :  { %2449 = vmatprep.subr.bf16.mxu1 %v2695_v59  ;;  %v90_v59 = vld [vmem:[#allocation2 + $0x48] sm:$0xff] }
  0x9e   :  { %2428 = vmatpush3.bf16.msra.mxu0 %v2696_v60  ;;  %v2111_v60 = vcombine.low %v90_v59, %v90_v59 }
  0x9f   :  { %2450 = vmatpush3.bf16.msra.mxu1 %v2697_v61  ;;  %2429 = vmatprep.subr.bf16.mxu0 %v2698_v62  ;;  %v2112_v61 = vcombine.high %v90_v59, %v90_v59  ;;  %v2758_v62 = vld [vmem:[#allocation7 + $0x38] sm:$0xff]  }
  0xa0   :  { %2451 = vmatprep.subr.bf16.mxu1 %v2699_v63  ;;  %v2888_v63 = vmov 0.0  }
  0xa2   :  { %2430 = vmatpush3.bf16.msra.mxu0 %v2700_v0  ;;  %v2759_v0 = vld [vmem:[#allocation7 + $0x30] sm:$0xff]  }
  0xa3   :  { %2452 = vmatpush3.bf16.msra.mxu1 %v2701_v1  ;;  %2431 = vmatprep.subr.bf16.mxu0 %v2702_v2  ;;  %v2760_v1 = vld [vmem:[#allocation7 + $0x28] sm:$0xff]   ;;  %v2761_v2 = vld [vmem:[#allocation7 + $0x20] sm:$0xff]  }
  0xa4   :  { %2453 = vmatprep.subr.bf16.mxu1 %v2703_v3  ;;  %v2762_v3 = vld [vmem:[#allocation7 + $0x18] sm:$0xff]  }
  0xa6   :  { %2432 = vmatpush3.bf16.msra.mxu0 %v2704_v4 }
  0xa7   :  { %2454 = vmatpush3.bf16.msra.mxu1 %v2705_v5  ;;  %2433 = vmatprep.subr.bf16.mxu0 %v2706_v6  ;;  %v2092_v6 = vld [vmem:[%s2984_s2] ss:$0 sm:$0xff] }
  0xa8   :  { %2455 = vmatprep.subr.bf16.mxu1 %v2707_v7 }
  0xaa   :  { %2434 = vmatpush3.bf16.msra.mxu0 %v2708_v8 }
  0xab   :  { %2456 = vmatpush3.bf16.msra.mxu1 %v2709_v9  ;;  %2435 = vmatprep.subr.bf16.mxu0 %v2710_v10 }
  0xac   :  { %2457 = vmatprep.subr.bf16.mxu1 %v2711_v11  ;;  %v2763_v11 = vld [vmem:[#allocation7 + $0x10] sm:$0xff]  }
  0xae   :  { %2436 = vmatpush3.bf16.msra.mxu0 %v2712_v12 }
  0xaf   :  { %2458 = vmatpush3.bf16.msra.mxu1 %v2713_v13  ;;  %2437 = vmatprep.subr.bf16.mxu0 %v2714_v14 }
  0xb0   :  { %2459 = vmatprep.subr.bf16.mxu1 %v2715_v15 }
  0xb2   :  { %2438 = vmatpush3.bf16.msra.mxu0 %v2716_v16 }
  0xb3   :  { %2460 = vmatpush3.bf16.msra.mxu1 %v2717_v17  ;;  %2467 = vmatprep.subr.bf16.mxu0 %v2722_v23  ;;  %v2769_v23 = vld [vmem:[#allocation8 + $0x20] sm:$0xff]  }
  0xb4   :  { %2489 = vmatprep.subr.bf16.mxu1 %v2723_v25 }
  0xb5   :  { %1721 = vmatmul.mubr.bf16.vlgmr.msra.gmra.mxu0 %v2105_v20  ;;  %v2766_v20 = vld [vmem:[#allocation8 + $0x38] sm:$0xff]  }
  0xb6   :  { %1761 = vmatmul.mubr.bf16.vlgmr.msra.gmra.mxu1 %v2107_v22  ;;  %2468 = vmatpush3.bf16.msra.mxu0 %v2724_v26  ;;  %v2768_v22 = vld [vmem:[#allocation8 + $0x28] sm:$0xff]  }
  0xb7   :  { %2490 = vmatpush3.bf16.msra.mxu1 %v2725_v27  ;;  %2469 = vmatprep.subr.bf16.mxu0 %v2726_v28  ;;  %v2771_v27 = vld [vmem:[#allocation8 + $0x10] sm:$0xff]  }
  0xb8   :  { %2491 = vmatprep.subr.bf16.mxu1 %v2727_v29  ;;  %1800 = vmatprep.mubr.bf16.mxu0 %v2110_v58 }
  0xb9   :  { %1840 = vmatprep.mubr.bf16.mxu1 %v2112_v61 }
  0xba   :  { %2470 = vmatpush3.bf16.msra.mxu0 %v2728_v30 }
  0xbb   :  { %2492 = vmatpush3.bf16.msra.mxu1 %v2729_v31  ;;  %2471 = vmatprep.subr.bf16.mxu0 %v2730_v32 }
  0xbc   :  { %2493 = vmatprep.subr.bf16.mxu1 %v2731_v33 }
  0xbe   :  { %2472 = vmatpush3.bf16.msra.mxu0 %v2732_v34 }
  0xbf   :  { %2494 = vmatpush3.bf16.msra.mxu1 %v2733_v35  ;;  %2473 = vmatprep.subr.bf16.mxu0 %v2734_v36 }
  0xc0   :  { %2495 = vmatprep.subr.bf16.mxu1 %v2735_v37 }
  0xc2   :  { %2474 = vmatpush3.bf16.msra.mxu0 %v2736_v38 }
  0xc3   :  { %2496 = vmatpush3.bf16.msra.mxu1 %v2737_v39  ;;  %2475 = vmatprep.subr.bf16.mxu0 %v2738_v40 }
  0xc4   :  { %2497 = vmatprep.subr.bf16.mxu1 %v2739_v41 }
  0xc6   :  { %2476 = vmatpush3.bf16.msra.mxu0 %v2740_v42 }
  0xc7   :  { %2498 = vmatpush3.bf16.msra.mxu1 %v2741_v43  ;;  %2477 = vmatprep.subr.bf16.mxu0 %v2742_v44 }
  0xc8   :  { %2499 = vmatprep.subr.bf16.mxu1 %v2743_v45 }
  0xca   :  { %2478 = vmatpush3.bf16.msra.mxu0 %v2744_v46 }
  0xcb   :  { %2500 = vmatpush3.bf16.msra.mxu1 %v2745_v47  ;;  %2479 = vmatprep.subr.bf16.mxu0 %v2746_v48 }
  0xcc   :  { %2501 = vmatprep.subr.bf16.mxu1 %v2747_v49 }
  0xce   :  { %2480 = vmatpush3.bf16.msra.mxu0 %v2748_v50 }
  0xcf   :  { %2502 = vmatpush3.bf16.msra.mxu1 %v2749_v51  ;;  %2481 = vmatprep.subr.bf16.mxu0 %v2750_v52 }
  0xd0   :  { %2503 = vmatprep.subr.bf16.mxu1 %v2751_v53 }
  0xd2   :  { %2482 = vmatpush3.bf16.msra.mxu0 %v2752_v54 }
  0xd3   :  { %2504 = vmatpush3.bf16.msra.mxu1 %v2753_v55  ;;  %2529 = vmatprep.subr.bf16.mxu0 %v2888_v63 }
  0xd4   :  { %2549 = vmatprep.subr.bf16.mxu1 %v2888_v63 }
  0xd5   :  { %1801 = vmatmul.mubr.bf16.vlgmr.msra.gmra.mxu0 %v2109_v57 }
  0xd6   :  { %1841 = vmatmul.mubr.bf16.vlgmr.msra.gmra.mxu1 %v2111_v60  ;;  %2530 = vmatpush3.bf16.msra.mxu0 %v2758_v62 }
  0xd7   :  { %2531 = vmatprep.subr.bf16.mxu0 %v2888_v63  ;;  %2545 = vmatprep.mubr.msk.bf16.mxu0 %vm2889_vm0, %v2888_v63 }
  0xd8   :  { %2565 = vmatprep.mubr.msk.bf16.mxu1 %vm2889_vm0, %v2888_v63  ;;  %2550 = vmatpush3.bf16.msra.mxu1 %v2766_v20 }
  0xd9   :  { %2551 = vmatprep.subr.bf16.mxu1 %v2888_v63 }
  0xda   :  { %2532 = vmatpush3.bf16.msra.mxu0 %v2759_v0 }
  0xdb   :  { %2533 = vmatprep.subr.bf16.mxu0 %v2888_v63 }
  0xdc   :  { %2552 = vmatpush3.bf16.msra.mxu1 %v2767_v21 }
  0xdd   :  { %2553 = vmatprep.subr.bf16.mxu1 %v2888_v63 }
  0xde   :  { %2534 = vmatpush3.bf16.msra.mxu0 %v2760_v1 }
  0xdf   :  { %2535 = vmatprep.subr.bf16.mxu0 %v2888_v63 }
  0xe0   :  { %2554 = vmatpush3.bf16.msra.mxu1 %v2768_v22 }
  0xe1   :  { %2555 = vmatprep.subr.bf16.mxu1 %v2888_v63 }
  0xe2   :  { %2536 = vmatpush3.bf16.msra.mxu0 %v2761_v2 }
  0xe3   :  { %2537 = vmatprep.subr.bf16.mxu0 %v2888_v63 }
  0xe4   :  { %2556 = vmatpush3.bf16.msra.mxu1 %v2769_v23  ;;  %v2282_v23 = vld [vmem:[%s2988_s6] ss:$0 sm:$0xff] }
  0xe5   :  { %2557 = vmatprep.subr.bf16.mxu1 %v2888_v63 }
  0xe6   :  { %2538 = vmatpush3.bf16.msra.mxu0 %v2762_v3 }
  0xe7   :  { %2539 = vmatprep.subr.bf16.mxu0 %v2888_v63 }
  0xe8   :  { %2558 = vmatpush3.bf16.msra.mxu1 %v2770_v24 }
  0xe9   :  { %2559 = vmatprep.subr.bf16.mxu1 %v2888_v63 }
  0xea   :  { %2540 = vmatpush3.bf16.msra.mxu0 %v2763_v11 }
  0xeb   :  { %2541 = vmatprep.subr.bf16.mxu0 %v2888_v63 }
  0xec   :  { %2560 = vmatpush3.bf16.msra.mxu1 %v2771_v27 }
  0xed   :  { %2561 = vmatprep.subr.bf16.mxu1 %v2888_v63 }
  0xee   :  { %2542 = vmatpush3.bf16.msra.mxu0 %v2764_v18 }
  0xef   :  { %2543 = vmatprep.subr.bf16.mxu0 %v2888_v63 }
  0xf2   :  { %2544 = vmatpush3.bf16.msra.mxu0 %v2765_v19 }
 0x115   :  { %v2307_v4 = vpop.f32.mrf.mxu0 }
 0x116   :  { %v2329_v5 = vpop.f32.mrf.mxu1 }
 0x117   :  { %v2308_v7 = vpop.f32.mrf.mxu0 }
 0x118   :  { %v2330_v8 = vpop.f32.mrf.mxu1  ;;  %v2309_v9 = vadd.f32 %v2308_v7, %v2307_v4 }
 0x119   :  { %v2331_v10 = vadd.f32 %v2330_v8, %v2329_v5  ;;  %v2310_v12 = vpop.f32.mrf.mxu0 }
 0x11a   :  { %v2332_v13 = vpop.f32.mrf.mxu1  ;;  %v1483_v14 = vadd.f32 %v2309_v9, %v2092_v6 }
 0x11b   :  { %v2311_v15 = vpop.f32.mrf.mxu0  ;;  %v2772_v13 = vld [vmem:[#allocation8 + $0x8] sm:$0xff]  }
 0x11c   :  { %v2333_v16 = vpop.f32.mrf.mxu1  ;;  %v1523_v17 = vadd.f32 %v2331_v10, %v1483_v14  ;;  %2562 = vmatpush3.bf16.msra.mxu1 %v2772_v13  ;;  %v2773_v14 = vld [vmem:[#allocation8] sm:$0xff]   ;;  %v2273_v15 = vld [vmem:[%s2986_s4] ss:$0 sm:$0xff]  ;;  %s2854_s4 = scalar_lea.vmem %s2082_s25, 128 }
 0x11d   :  { %2563 = vmatprep.subr.bf16.mxu1 %v2888_v63  ;;  %p2855_p6 = scmp.ne.s32.totalorder %s2082_s25, %s2854_s4  ;;  %p2860_p8 = scmp.lt.s32.totalorder %s2854_s4, %s2854_s4 }
 0x11f   :  { %p2861_p9 = por %p2860_p8, %p2859_p7 }
 0x120   :  { %2564 = vmatpush3.bf16.msra.mxu1 %v2773_v14 }
 0x121   :  { %p2862_p10 = pnand %p2861_p9, %p2855_p6 }
 0x135   :  { %v2351_v25 = vpop.f32.mrf.mxu0 }
 0x136   :  { %v2373_v26 = vpop.f32.mrf.mxu1 }
 0x137   :  { %v2352_v28 = vpop.f32.mrf.mxu0 }
 0x138   :  { %v2374_v29 = vpop.f32.mrf.mxu1  ;;  %v2353_v30 = vadd.f32 %v2352_v28, %v2351_v25 }
 0x139   :  { %v2375_v31 = vadd.f32 %v2374_v29, %v2373_v26  ;;  %v2354_v32 = vpop.f32.mrf.mxu0 }
 0x13a   :  { %v2376_v33 = vpop.f32.mrf.mxu1  ;;  %v1563_v34 = vadd.f32 %v2353_v30, %v1523_v17 }
 0x13b   :  { %v2355_v35 = vpop.f32.mrf.mxu0 }
 0x13c   :  { %v2377_v36 = vpop.f32.mrf.mxu1  ;;  %v1603_v37 = vadd.f32 %v2375_v31, %v1563_v34 }
 0x155   :  { %v2395_v38 = vpop.f32.mrf.mxu0 }
 0x156   :  { %v2417_v39 = vpop.f32.mrf.mxu1 }
 0x157   :  { %v2396_v40 = vpop.f32.mrf.mxu0 }
 0x158   :  { %v2418_v41 = vpop.f32.mrf.mxu1  ;;  %v2397_v54 = vadd.f32 %v2396_v40, %v2395_v38 }
 0x159   :  { %v2398_v42 = vpop.f32.mrf.mxu0  ;;  %v2419_v56 = vadd.f32 %v2418_v41, %v2417_v39 }
 0x15a   :  { %v2420_v43 = vpop.f32.mrf.mxu1  ;;  %v1643_v55 = vadd.f32 %v2397_v54, %v1603_v37 }
 0x15b   :  { %v2399_v44 = vpop.f32.mrf.mxu0 }
 0x15c   :  { %v2421_v45 = vpop.f32.mrf.mxu1  ;;  %v1683_v58 = vadd.f32 %v2419_v56, %v1643_v55 }
 0x175   :  { %v2439_v46 = vpop.f32.mrf.mxu0 }
 0x176   :  { %v2461_v47 = vpop.f32.mrf.mxu1 }
 0x177   :  { %v2440_v48 = vpop.f32.mrf.mxu0 }
 0x178   :  { %v2462_v49 = vpop.f32.mrf.mxu1  ;;  %v2441_v57 = vadd.f32 %v2440_v48, %v2439_v46 }
 0x179   :  { %v2442_v50 = vpop.f32.mrf.mxu0  ;;  %v2463_v60 = vadd.f32 %v2462_v49, %v2461_v47 }
 0x17a   :  { %v2464_v51 = vpop.f32.mrf.mxu1  ;;  %v1723_v59 = vadd.f32 %v2441_v57, %v1683_v58 }
 0x17b   :  { %v2443_v52 = vpop.f32.mrf.mxu0 }
 0x17c   :  { %v2465_v53 = vpop.f32.mrf.mxu1  ;;  %v1763_v2 = vadd.f32 %v2463_v60, %v1723_v59 }
 0x195   :  { %v2483_v61 = vpop.f32.mrf.mxu0 }
 0x196   :  { %v2505_v62 = vpop.f32.mrf.mxu1 }
 0x197   :  { %v2484_v0 = vpop.f32.mrf.mxu0 }
 0x198   :  { %v2506_v1 = vpop.f32.mrf.mxu1  ;;  %v2485_v3 = vadd.f32 %v2484_v0, %v2483_v61 }
 0x199   :  { %v2486_v4 = vpop.f32.mrf.mxu0  ;;  %v2507_v7 = vadd.f32 %v2506_v1, %v2505_v62 }
 0x19a   :  { %v2508_v5 = vpop.f32.mrf.mxu1  ;;  %v1803_v6 = vadd.f32 %v2485_v3, %v1763_v2 }
 0x19b   :  { %v2487_v8 = vpop.f32.mrf.mxu0 }
 0x19c   :  { %v2509_v9 = vpop.f32.mrf.mxu1  ;;  %v1843_v10 = vadd.f32 %v2507_v7, %v1803_v6 }
 0x19e   :  { %v1848_v11 = vmax.f32 %v1843_v10, 0.0 }
 0x1a0   :  { %v1849_v12 = vpack.c.bf16 %v1848_v11, %v1848_v11 }
 0x1a2   :  { %2546 = vmatmul.mubr.bf16.vlgmr.msra.gmra.mxu0 %v1849_v12 }
 0x262   :  { %v1955_v16 = vpop.f32.mrf.mxu0 }
 0x263   :  { %v1956_v17 = vadd.f32 %v2273_v15, %v1955_v16 }
 0x264   :  { %v2547_v18 = vpop.f32.mrf.mxu0 }
 0x265   :  { %v1961_v19 = vmax.f32 %v1956_v17, 0.0 }
 0x266   :  { %v1958_v20 = vpop.f32.mrf.mxu0 }
 0x267   :  { %v1962_v21 = vpack.c.bf16 %v1961_v19, %v1961_v19 }
 0x268   :  { %v2548_v22 = vpop.f32.mrf.mxu0 }
 0x269   :  { %2566 = vmatmul.mubr.bf16.vlgmr.msra.gmra.mxu1 %v1962_v21 }
 0x329   :  { %v2068_v63 = vpop.f32.mrf.mxu1 }
 0x32a   :  { %v2069_v24 = vadd.f32 %v2282_v23, %v2068_v63 }
 0x32b   :  { %v2567_v25 = vpop.f32.mrf.mxu1 }
 0x32c   :  { %2074 = vst [vmem:[#allocation10] sm:$0xff] %v2069_v24 }
 0x32d   :  { %v2071_v26 = vpop.f32.mrf.mxu1 }
 0x32e   :  { %2865 = shalt.err (!%p2862_p10)
}
 0x32f   :  { %2084 = dma.vmem_to_hbm [thread:$0]  %s2082_s25, 128, %s2989_s7, [#allocation4]   ;;  %v2568_v27 = vpop.f32.mrf.mxu1 }
 0x330   :  { %2880 = dma.done.wait [#allocation4], 128  }
 0x331   :  { %2881 = vsyncadd [#allocation4], 4294967168 }
 0x332   :  { %2088 = vsyncpa [#allocation3], 1 }
 0x333   :  { %2089 = vsyncpa [#allocation6], 1 }
 0x334   :  { %2090 = vsyncpa [#allocation9], 1 }
 0x335   :  { %2091 = vsyncpa [#allocation4], 1 }

</bundles_post_ra>
